<compile_context>
chip_gen: v7x
topology: tpu7x:2x2x1
jax: 0.10.0
libtpu: 0.0.40
codegen_flags: <defaults>
</compile_context>

<pallas_src>
import functools

import jax
import jax.numpy as jnp
from jax import lax
from jax.experimental import pallas as pl
from jax.experimental.pallas import tpu as pltpu


def _round_up(x, m):
    return (x + m - 1) // m * m


def _mlp_block(own_bf16, gathered_bf16, w1_ref, b1_ref, w2_ref, b2_ref, out_dtype):
    """relu(cat([own, gathered]) @ w1 + b1) @ w2 + b2 with f32 accumulation.

    The lane-concat + pre-stacked w1 gives a single K=2*RP MXU matmul (no split
    matmuls, no concat in the wrapper)."""
    cat = jnp.concatenate([own_bf16, gathered_bf16], axis=-1)          # (rows, 2*RP) bf16
    h = jnp.dot(cat, w1_ref[...], preferred_element_type=jnp.float32) + b1_ref[...]
    h = jnp.maximum(h, 0.0)                                            # f32 ReLU
    out = (jnp.dot(h.astype(jnp.bfloat16), w2_ref[...],
                   preferred_element_type=jnp.float32) + b2_ref[...])
    return out.astype(out_dtype)


def _edge_kernel(src_ref, dst_ref, edge_rep_ref, node_rep_ref,
                 w1_ref, b1_ref, w2_ref, b2_ref, edge_out_ref, n2e_ref):
    """One edge-row tile: gather endpoint node rows (SMEM indices) + edge MLP."""
    te = n2e_ref.shape[0]
    base = pl.program_id(0) * te

    def gather_row(j, carry):
        s = src_ref[base + j]
        d = dst_ref[base + j]
        n2e_ref[pl.ds(j, 1), :] = (node_rep_ref[pl.ds(s, 1), :]
                                   + node_rep_ref[pl.ds(d, 1), :])      # f32 exact sum
        return carry

    lax.fori_loop(0, te, gather_row, 0)

    edge_out_ref[...] = _mlp_block(edge_rep_ref[...],
                                   n2e_ref[...].astype(jnp.bfloat16),
                                   w1_ref, b1_ref, w2_ref, b2_ref,
                                   edge_out_ref.dtype)


def _scatter_kernel(src_ref, dst_ref, edge_out_ref, e2n_ref, ebuf_ref, *, num_edges):
    """edge2node[n] = sum of edge_out over edges incident to n (f32 accumulation).

    Loops only over the real `num_edges` edges, so padded edge rows (garbage values)
    can never contaminate edge2node; padded node rows stay exactly zero."""
    ebuf_ref[...] = edge_out_ref[...].astype(jnp.float32)   # single vectorized upcast
    e2n_ref[...] = jnp.zeros_like(e2n_ref)

    def add_edge(e, carry):
        row = ebuf_ref[pl.ds(e, 1), :]
        s = src_ref[e]
        d = dst_ref[e]
        e2n_ref[pl.ds(s, 1), :] = e2n_ref[pl.ds(s, 1), :] + row
        e2n_ref[pl.ds(d, 1), :] = e2n_ref[pl.ds(d, 1), :] + row
        return carry

    lax.fori_loop(0, num_edges, add_edge, 0)


def _node_kernel(node_rep_ref, e2n_ref, w1_ref, b1_ref, w2_ref, b2_ref, node_out_ref):
    """One node-row tile: node MLP on cat([node_rep, edge2node])."""
    node_out_ref[...] = _mlp_block(node_rep_ref[...].astype(jnp.bfloat16),
                                   e2n_ref[...].astype(jnp.bfloat16),
                                   w1_ref, b1_ref, w2_ref, b2_ref,
                                   node_out_ref.dtype)


def preprocess_params(params, rep_dim):
    """Pad / fuse / cast the weights ONCE (hoisted out of the per-step forward)."""
    R = rep_dim
    inner = params["e_w1"].shape[1]
    RP = _round_up(R, 128)
    IP = _round_up(inner, 128)
    bf16, f32 = jnp.bfloat16, jnp.float32

    def pad2(x, rows, cols):
        return jnp.pad(x, ((0, rows - x.shape[0]), (0, cols - x.shape[1])))

    def fuse_w1(w1):
        # torch.cat([own, gathered], -1): rows [:R] act on the own rep, rows [R:] on
        # the gathered rep.  Pad each half to RP rows and restack so a single K=2*RP
        # matmul matches the in-kernel lane-concat [own(RP) | gathered(RP)] layout.
        return jnp.concatenate([pad2(w1[:R], RP, IP),
                                pad2(w1[R:], RP, IP)], axis=0).astype(bf16)

    return {
        "e_w1": fuse_w1(params["e_w1"]),
        "e_b1": pad2(params["e_b1"], 1, IP).astype(f32),
        "e_w2": pad2(params["e_w2"], IP, RP).astype(bf16),
        "e_b2": pad2(params["e_b2"], 1, RP).astype(f32),
        "n_w1": fuse_w1(params["n_w1"]),
        "n_b1": pad2(params["n_b1"], 1, IP).astype(f32),
        "n_w2": pad2(params["n_w2"], IP, RP).astype(bf16),
        "n_b2": pad2(params["n_b2"], 1, RP).astype(f32),
    }


@functools.partial(jax.jit, static_argnames=("tile_e", "tile_n"))
def edge_node_forward(node_rep, edge_rep, src, dst, prep, tile_e=512, tile_n=512):
    """Edge_node forward. src/dst are the per-edge endpoint node indices."""
    N, R = node_rep.shape
    E = edge_rep.shape[0]
    RP = prep["e_w1"].shape[0] // 2
    IP = prep["e_w1"].shape[1]

    TE = min(_round_up(tile_e, 16), _round_up(E, 16))
    TN = min(_round_up(tile_n, 16), _round_up(N, 16))
    EP = _round_up(E, TE)
    NP = _round_up(N, TN)

    f32, bf16, i32 = jnp.float32, jnp.bfloat16, jnp.int32

    # Activations: per-call padding/casting only (weights already preprocessed once).
    # node_rep kept f32 so the in-kernel dynamic row gather stays on clean f32 rows.
    node_p = jnp.pad(node_rep, ((0, NP - N), (0, RP - R))).astype(f32)
    edge_p = jnp.pad(edge_rep, ((0, EP - E), (0, RP - R))).astype(bf16)
    src_p = jnp.pad(src.astype(i32), ((0, EP - E),))
    dst_p = jnp.pad(dst.astype(i32), ((0, EP - E),))

    vmem_cap = 32 * 1024 * 1024   # modest cap; actual footprint is << this
    cparams_par = pltpu.CompilerParams(dimension_semantics=("parallel",),
                                       vmem_limit_bytes=vmem_cap)
    cparams_seq = pltpu.CompilerParams(dimension_semantics=("arbitrary",),
                                       vmem_limit_bytes=vmem_cap)

    rows2 = lambda i, s, d: (i, 0)     # row-tiled operands (index maps see prefetch refs)
    const2 = lambda i, s, d: (0, 0)    # VMEM-resident operands

    # ---- phase 1: gather node->edge + edge MLP, tiled over edge rows ("parallel") ----
    edge_out_p = pl.pallas_call(
        _edge_kernel,
        out_shape=jax.ShapeDtypeStruct((EP, RP), bf16),
        grid_spec=pltpu.PrefetchScalarGridSpec(
            num_scalar_prefetch=2,                      # src, dst -> SMEM
            grid=(EP // TE,),
            in_specs=[
                pl.BlockSpec((TE, RP), rows2),          # edge_rep tile (bf16)
                pl.BlockSpec((NP, RP), const2),         # node_rep, VMEM-resident (f32)
                pl.BlockSpec((2 * RP, IP), const2),     # fused first-layer weight
                pl.BlockSpec((1, IP), const2),
                pl.BlockSpec((IP, RP), const2),
                pl.BlockSpec((1, RP), const2),
            ],
            out_specs=pl.BlockSpec((TE, RP), rows2),
            scratch_shapes=[pltpu.VMEM((TE, RP), f32)],
        ),
        compiler_params=cparams_par,
    )(src_p, dst_p, edge_p, node_p,
      prep["e_w1"], prep["e_b1"], prep["e_w2"], prep["e_b2"])

    # ---- phase 2: segment-sum edge->node (sequential over the real E edges) ----------
    edge2node_p = pl.pallas_call(
        functools.partial(_scatter_kernel, num_edges=E),
        out_shape=jax.ShapeDtypeStruct((NP, RP), f32),
        grid_spec=pltpu.PrefetchScalarGridSpec(
            num_scalar_prefetch=2,
            grid=(1,),
            in_specs=[pl.BlockSpec((EP, RP), const2)],  # edge_out (bf16), fully resident
            out_specs=pl.BlockSpec((NP, RP), const2),
            scratch_shapes=[pltpu.VMEM((EP, RP), f32)],
        ),
        compiler_params=cparams_seq,
    )(src_p, dst_p, edge_out_p)

    # ---- phase 3: node MLP, tiled over node rows ("parallel") -------------------------
    rows1 = lambda i: (i, 0)
    const1 = lambda i: (0, 0)
    node_out_p = pl.pallas_call(
        _node_kernel,
        out_shape=jax.ShapeDtypeStruct((NP, RP), bf16),
        grid_spec=pltpu.PrefetchScalarGridSpec(
            num_scalar_prefetch=0,
            grid=(NP // TN,),
            in_specs=[
                pl.BlockSpec((TN, RP), rows1),          # node_rep tile (f32, cast in-kernel)
                pl.BlockSpec((TN, RP), rows1),          # edge2node tile (f32)
                pl.BlockSpec((2 * RP, IP), const1),
                pl.BlockSpec((1, IP), const1),
                pl.BlockSpec((IP, RP), const1),
                pl.BlockSpec((1, RP), const1),
            ],
            out_specs=pl.BlockSpec((TN, RP), rows1),
        ),
        compiler_params=cparams_par,
    )(node_p, edge2node_p,
      prep["n_w1"], prep["n_b1"], prep["n_w2"], prep["n_b2"])

    # Padded rows carry bias->relu->bias garbage; they are sliced off here and were never
    # scattered into edge2node (scatter loops over the real E edges only).
    return node_out_p[:N, :R], edge_out_p[:E, :R]


def reference_forward(node_rep, edge_rep, inc, params):
    node2edge = inc.T @ node_rep
    edge_cat = jnp.concatenate([edge_rep, node2edge], axis=-1)
    edge_out = (jnp.maximum(edge_cat @ params["e_w1"] + params["e_b1"], 0.0)
                @ params["e_w2"] + params["e_b2"])
    edge2node = inc @ edge_out
    node_cat = jnp.concatenate([node_rep, edge2node], axis=-1)
    node_out = (jnp.maximum(node_cat @ params["n_w1"] + params["n_b1"], 0.0)
                @ params["n_w2"] + params["n_b2"])
    return node_out, edge_out


def make_params(key, rep_dim):
    inner = 2 * rep_dim        # _inner_mlp_mult = 2
    keys = jax.random.split(key, 8)

    def lin(k, fan_in, fan_out):
        return jax.random.normal(k, (fan_in, fan_out), jnp.float32) / jnp.sqrt(jnp.float32(fan_in))

    return {
        # edge_mlp_0: 2R -> 2R -> R
        "e_w1": lin(keys[0], 2 * rep_dim, inner),
        "e_b1": jax.random.normal(keys[1], (1, inner), jnp.float32) * 0.01,
        "e_w2": lin(keys[2], inner, rep_dim),
        "e_b2": jax.random.normal(keys[3], (1, rep_dim), jnp.float32) * 0.01,
        # node_mlp: 2R -> 2R -> R
        "n_w1": lin(keys[4], 2 * rep_dim, inner),
        "n_b1": jax.random.normal(keys[5], (1, inner), jnp.float32) * 0.01,
        "n_w2": lin(keys[6], inner, rep_dim),
        "n_b2": jax.random.normal(keys[7], (1, rep_dim), jnp.float32) * 0.01,
    }


if __name__ == "__main__":
    key = jax.random.PRNGKey(0)
    k_node, k_edge, k_graph, k_param = jax.random.split(key, 4)

    N = 32          # nodes
    E = 64          # edges
    R = 32          # rep_dim

    node_rep = jax.random.normal(k_node, (N, R), jnp.float32)
    edge_rep = jax.random.normal(k_edge, (E, R), jnp.float32)

    # Deterministic small graph: ring edges + random chords (src != dst).
    src_ring = jnp.arange(N, dtype=jnp.int32)
    dst_ring = (src_ring + 1) % N
    k_a, k_b = jax.random.split(k_graph)
    src_rand = jax.random.randint(k_a, (E - N,), 0, N, dtype=jnp.int32)
    dst_rand = (src_rand + 1 + jax.random.randint(k_b, (E - N,), 0, N - 1, dtype=jnp.int32)) % N
    src = jnp.concatenate([src_ring, src_rand])
    dst = jnp.concatenate([dst_ring, dst_rand])

    params = make_params(k_param, R)
    # Weight padding / fusing / bf16 casting happens ONCE here (hoisted out of the
    # per-step forward) and the preprocessed tensors are reused across calls.
    prep = preprocess_params(params, R)

    # Small tiles so the demo exercises multi-step grids (default 512 for real sizes).
    node_out, edge_out = edge_node_forward(node_rep, edge_rep, src, dst, prep,
                                           tile_e=16, tile_n=16)
    jax.block_until_ready((node_out, edge_out))

    # Dense incidence matrix only for the pure-JAX reference.
    e_idx = jnp.arange(E, dtype=jnp.int32)
    inc = jnp.zeros((N, E), jnp.float32).at[src, e_idx].set(1.0).at[dst, e_idx].set(1.0)
    node_ref, edge_ref = reference_forward(node_rep, edge_rep, inc, params)

    assert node_out.shape == (N, R) and edge_out.shape == (E, R)
    # bf16 MXU operands and bf16 outputs (f32 accumulation): loosened tolerance vs f32 ref.
    assert jnp.allclose(edge_out.astype(jnp.float32), edge_ref, atol=1e-1, rtol=5e-2)
    assert jnp.allclose(node_out.astype(jnp.float32), node_ref, atol=1e-1, rtol=5e-2)

    print("KERNEL_OK")
</pallas_src>

<mosaic_0001>
module attributes {stable_mosaic.version = 11 : i64} {
  func.func @_scatter_kernel(%arg0: i32, %arg1: memref<64xi32, #tpu.memory_space<smem>>, %arg2: memref<64xi32, #tpu.memory_space<smem>>, %arg3: memref<64x128xbf16, #tpu.memory_space<vmem>>, %arg4: memref<32x128xf32, #tpu.memory_space<vmem>>, %arg5: memref<64x128xf32, #tpu.memory_space<vmem>>) attributes {dimension_semantics = [#tpu.dimension_semantics<arbitrary>], iteration_bounds = array<i64: 1>, scalar_prefetch = 2 : i64, scratch_operands = 1 : i64, tpu.core_type = #tpu.core_type<tc>, window_params = [{pipeline_mode = #tpu.pipeline_mode<synchronous>, transform_indices = @transform_0, window_bounds = array<i64: 64, 128>}, {pipeline_mode = #tpu.pipeline_mode<synchronous>, transform_indices = @transform_1, window_bounds = array<i64: 32, 128>}]} {
    %c0 = arith.constant 0 : index
    %c0_0 = arith.constant 0 : index
    %0 = vector.load %arg3[%c0, %c0_0] : memref<64x128xbf16, #tpu.memory_space<vmem>>, vector<64x128xbf16>
    %1 = arith.extf %0 : vector<64x128xbf16> to vector<64x128xf32>
    %c0_1 = arith.constant 0 : index
    %c0_2 = arith.constant 0 : index
    %2 = vector.load %arg5[%c0_1, %c0_2] : memref<64x128xf32, #tpu.memory_space<vmem>>, vector<64x128xf32>
    tpu.vector_store %arg5[%c0_1, %c0_2], %1 {strides = array<i32>} : memref<64x128xf32, #tpu.memory_space<vmem>>, vector<64x128xf32>,
    %cst = arith.constant 0.000000e+00 : f32
    %3 = vector.broadcast %cst : f32 to vector<32x128xf32>
    %c0_3 = arith.constant 0 : index
    %c0_4 = arith.constant 0 : index
    %4 = vector.load %arg4[%c0_3, %c0_4] : memref<32x128xf32, #tpu.memory_space<vmem>>, vector<32x128xf32>
    tpu.vector_store %arg4[%c0_3, %c0_4], %3 {strides = array<i32>} : memref<32x128xf32, #tpu.memory_space<vmem>>, vector<32x128xf32>,
    %c0_i32 = arith.constant 0 : i32
    %c64_i32 = arith.constant 64 : i32
    %5 = arith.addi %c0_i32, %c64_i32 : i32
    %c1_i32 = arith.constant 1 : i32
    scf.for %arg6 = %c0_i32 to %5 step %c1_i32  : i32 {
      %6 = arith.index_cast %arg6 : i32 to index
      %c0_6 = arith.constant 0 : index
      %7 = vector.load %arg5[%6, %c0_6] : memref<64x128xf32, #tpu.memory_space<vmem>>, vector<1x128xf32>
      %8 = arith.index_cast %arg6 : i32 to index
      %9 = memref.load %arg1[%8] : memref<64xi32, #tpu.memory_space<smem>>
      %10 = arith.index_cast %arg6 : i32 to index
      %11 = memref.load %arg2[%10] : memref<64xi32, #tpu.memory_space<smem>>
      %12 = arith.index_cast %9 : i32 to index
      %c0_7 = arith.constant 0 : index
      %13 = vector.load %arg4[%12, %c0_7] : memref<32x128xf32, #tpu.memory_space<vmem>>, vector<1x128xf32>
      %14 = arith.addf %13, %7 : vector<1x128xf32>
      %15 = arith.index_cast %9 : i32 to index
      %c0_8 = arith.constant 0 : index
      %16 = vector.load %arg4[%15, %c0_8] : memref<32x128xf32, #tpu.memory_space<vmem>>, vector<1x128xf32>
      tpu.vector_store %arg4[%15, %c0_8], %14 {strides = array<i32>} : memref<32x128xf32, #tpu.memory_space<vmem>>, vector<1x128xf32>,
      %17 = arith.index_cast %11 : i32 to index
      %c0_9 = arith.constant 0 : index
      %18 = vector.load %arg4[%17, %c0_9] : memref<32x128xf32, #tpu.memory_space<vmem>>, vector<1x128xf32>
      %19 = arith.addf %18, %7 : vector<1x128xf32>
      %20 = arith.index_cast %11 : i32 to index
      %c0_10 = arith.constant 0 : index
      %21 = vector.load %arg4[%20, %c0_10] : memref<32x128xf32, #tpu.memory_space<vmem>>, vector<1x128xf32>
      tpu.vector_store %arg4[%20, %c0_10], %19 {strides = array<i32>} : memref<32x128xf32, #tpu.memory_space<vmem>>, vector<1x128xf32>,
    }
    %c64_i32_5 = arith.constant 64 : i32
    return
  }
  func.func @transform_0(%arg0: i32, %arg1: memref<64xi32, #tpu.memory_space<smem>>, %arg2: memref<64xi32, #tpu.memory_space<smem>>) -> (i32, i32) {
    %c0_i32 = arith.constant 0 : i32
    %c0_i32_0 = arith.constant 0 : i32
    %c0_i32_1 = arith.constant 0 : i32
    return %c0_i32, %c0_i32_0 : i32, i32
  }
  func.func @transform_1(%arg0: i32, %arg1: memref<64xi32, #tpu.memory_space<smem>>, %arg2: memref<64xi32, #tpu.memory_space<smem>>) -> (i32, i32) {
    %c0_i32 = arith.constant 0 : i32
    %c0_i32_0 = arith.constant 0 : i32
    %c0_i32_1 = arith.constant 0 : i32
    return %c0_i32, %c0_i32_0 : i32, i32
  }
}

module attributes {stable_mosaic.version = 11 : i64} {
  func.func @_node_kernel(%arg0: i32, %arg1: memref<16x128xf32, #tpu.memory_space<vmem>>, %arg2: memref<16x128xf32, #tpu.memory_space<vmem>>, %arg3: memref<256x128xbf16, #tpu.memory_space<vmem>>, %arg4: memref<1x128xf32, #tpu.memory_space<vmem>>, %arg5: memref<128x128xbf16, #tpu.memory_space<vmem>>, %arg6: memref<1x128xf32, #tpu.memory_space<vmem>>, %arg7: memref<16x128xbf16, #tpu.memory_space<vmem>>) attributes {dimension_semantics = [#tpu.dimension_semantics<parallel>], iteration_bounds = array<i64: 2>, scalar_prefetch = 0 : i64, scratch_operands = 0 : i64, tpu.core_type = #tpu.core_type<tc>, window_params = [{transform_indices = @transform_0, window_bounds = array<i64: 16, 128>}, {transform_indices = @transform_1, window_bounds = array<i64: 16, 128>}, {pipeline_mode = #tpu.pipeline_mode<synchronous>, transform_indices = @transform_2, window_bounds = array<i64: 256, 128>}, {pipeline_mode = #tpu.pipeline_mode<synchronous>, transform_indices = @transform_3, window_bounds = array<i64: 1, 128>}, {pipeline_mode = #tpu.pipeline_mode<synchronous>, transform_indices = @transform_4, window_bounds = array<i64: 128, 128>}, {pipeline_mode = #tpu.pipeline_mode<synchronous>, transform_indices = @transform_5, window_bounds = array<i64: 1, 128>}, {transform_indices = @transform_6, window_bounds = array<i64: 16, 128>}]} {
    %c0 = arith.constant 0 : index
    %c0_0 = arith.constant 0 : index
    %0 = vector.load %arg1[%c0, %c0_0] : memref<16x128xf32, #tpu.memory_space<vmem>>, vector<16x128xf32>
    %1 = arith.truncf %0 : vector<16x128xf32> to vector<16x128xbf16>
    %c0_1 = arith.constant 0 : index
    %c0_2 = arith.constant 0 : index
    %2 = vector.load %arg2[%c0_1, %c0_2] : memref<16x128xf32, #tpu.memory_space<vmem>>, vector<16x128xf32>
    %3 = arith.truncf %2 : vector<16x128xf32> to vector<16x128xbf16>
    %4 = tpu.concatenate %1, %3 in 1 : vector<16x128xbf16>, vector<16x128xbf16> -> vector<16x256xbf16>
    %c0_3 = arith.constant 0 : index
    %c0_4 = arith.constant 0 : index
    %5 = vector.load %arg3[%c0_3, %c0_4] : memref<256x128xbf16, #tpu.memory_space<vmem>>, vector<256x128xbf16>
    %cst = arith.constant dense<0.000000e+00> : vector<16x128xf32>
    %6 = tpu.matmul %4, %5, %cst {dimension_numbers = #tpu.dot_dimension_numbers<[1], [0], [0], [1], [0, 0, 1, 1], [], []>} : vector<16x256xbf16>, vector<256x128xbf16>, vector<16x128xf32> -> vector<16x128xf32>
    %c0_5 = arith.constant 0 : index
    %c0_6 = arith.constant 0 : index
    %7 = vector.load %arg4[%c0_5, %c0_6] : memref<1x128xf32, #tpu.memory_space<vmem>>, vector<1x128xf32>
    %8 = vector.broadcast %7 : vector<1x128xf32> to vector<16x128xf32>
    %9 = arith.addf %6, %8 : vector<16x128xf32>
    %cst_7 = arith.constant 0.000000e+00 : f32
    %10 = vector.broadcast %cst_7 : f32 to vector<16x128xf32>
    %11 = arith.maximumf %9, %10 : vector<16x128xf32>
    %12 = arith.truncf %11 : vector<16x128xf32> to vector<16x128xbf16>
    %c0_8 = arith.constant 0 : index
    %c0_9 = arith.constant 0 : index
    %13 = vector.load %arg5[%c0_8, %c0_9] : memref<128x128xbf16, #tpu.memory_space<vmem>>, vector<128x128xbf16>
    %cst_10 = arith.constant dense<0.000000e+00> : vector<16x128xf32>
    %14 = tpu.matmul %12, %13, %cst_10 {dimension_numbers = #tpu.dot_dimension_numbers<[1], [0], [0], [1], [0, 0, 1, 1], [], []>} : vector<16x128xbf16>, vector<128x128xbf16>, vector<16x128xf32> -> vector<16x128xf32>
    %c0_11 = arith.constant 0 : index
    %c0_12 = arith.constant 0 : index
    %15 = vector.load %arg6[%c0_11, %c0_12] : memref<1x128xf32, #tpu.memory_space<vmem>>, vector<1x128xf32>
    %16 = vector.broadcast %15 : vector<1x128xf32> to vector<16x128xf32>
    %17 = arith.addf %14, %16 : vector<16x128xf32>
    %18 = arith.truncf %17 : vector<16x128xf32> to vector<16x128xbf16>
    %c0_13 = arith.constant 0 : index
    %c0_14 = arith.constant 0 : index
    %19 = vector.load %arg7[%c0_13, %c0_14] : memref<16x128xbf16, #tpu.memory_space<vmem>>, vector<16x128xbf16>
    tpu.vector_store %arg7[%c0_13, %c0_14], %18 {strides = array<i32>} : memref<16x128xbf16, #tpu.memory_space<vmem>>, vector<16x128xbf16>,
    return
  }
  func.func @transform_0(%arg0: i32) -> (i32, i32) {
    %c0_i32 = arith.constant 0 : i32
    %c0_i32_0 = arith.constant 0 : i32
    return %arg0, %c0_i32 : i32, i32
  }
  func.func @transform_1(%arg0: i32) -> (i32, i32) {
    %c0_i32 = arith.constant 0 : i32
    %c0_i32_0 = arith.constant 0 : i32
    return %arg0, %c0_i32 : i32, i32
  }
  func.func @transform_2(%arg0: i32) -> (i32, i32) {
    %c0_i32 = arith.constant 0 : i32
    %c0_i32_0 = arith.constant 0 : i32
    %c0_i32_1 = arith.constant 0 : i32
    return %c0_i32, %c0_i32_0 : i32, i32
  }
  func.func @transform_3(%arg0: i32) -> (i32, i32) {
    %c0_i32 = arith.constant 0 : i32
    %c0_i32_0 = arith.constant 0 : i32
    %c0_i32_1 = arith.constant 0 : i32
    return %c0_i32, %c0_i32_0 : i32, i32
  }
  func.func @transform_4(%arg0: i32) -> (i32, i32) {
    %c0_i32 = arith.constant 0 : i32
    %c0_i32_0 = arith.constant 0 : i32
    %c0_i32_1 = arith.constant 0 : i32
    return %c0_i32, %c0_i32_0 : i32, i32
  }
  func.func @transform_5(%arg0: i32) -> (i32, i32) {
    %c0_i32 = arith.constant 0 : i32
    %c0_i32_0 = arith.constant 0 : i32
    %c0_i32_1 = arith.constant 0 : i32
    return %c0_i32, %c0_i32_0 : i32, i32
  }
  func.func @transform_6(%arg0: i32) -> (i32, i32) {
    %c0_i32 = arith.constant 0 : i32
    %c0_i32_0 = arith.constant 0 : i32
    return %arg0, %c0_i32 : i32, i32
  }
}

module attributes {stable_mosaic.version = 11 : i64} {
  func.func @_edge_kernel(%arg0: i32, %arg1: memref<64xi32, #tpu.memory_space<smem>>, %arg2: memref<64xi32, #tpu.memory_space<smem>>, %arg3: memref<16x128xbf16, #tpu.memory_space<vmem>>, %arg4: memref<32x128xf32, #tpu.memory_space<vmem>>, %arg5: memref<256x128xbf16, #tpu.memory_space<vmem>>, %arg6: memref<1x128xf32, #tpu.memory_space<vmem>>, %arg7: memref<128x128xbf16, #tpu.memory_space<vmem>>, %arg8: memref<1x128xf32, #tpu.memory_space<vmem>>, %arg9: memref<16x128xbf16, #tpu.memory_space<vmem>>, %arg10: memref<16x128xf32, #tpu.memory_space<vmem>>) attributes {dimension_semantics = [#tpu.dimension_semantics<parallel>], iteration_bounds = array<i64: 4>, scalar_prefetch = 2 : i64, scratch_operands = 1 : i64, tpu.core_type = #tpu.core_type<tc>, window_params = [{transform_indices = @transform_0, window_bounds = array<i64: 16, 128>}, {pipeline_mode = #tpu.pipeline_mode<synchronous>, transform_indices = @transform_1, window_bounds = array<i64: 32, 128>}, {pipeline_mode = #tpu.pipeline_mode<synchronous>, transform_indices = @transform_2, window_bounds = array<i64: 256, 128>}, {pipeline_mode = #tpu.pipeline_mode<synchronous>, transform_indices = @transform_3, window_bounds = array<i64: 1, 128>}, {pipeline_mode = #tpu.pipeline_mode<synchronous>, transform_indices = @transform_4, window_bounds = array<i64: 128, 128>}, {pipeline_mode = #tpu.pipeline_mode<synchronous>, transform_indices = @transform_5, window_bounds = array<i64: 1, 128>}, {transform_indices = @transform_6, window_bounds = array<i64: 16, 128>}]} {
    %c16_i32 = arith.constant 16 : i32
    %0 = arith.muli %arg0, %c16_i32 : i32
    %c0_i32 = arith.constant 0 : i32
    %c16_i32_0 = arith.constant 16 : i32
    %1 = arith.addi %c0_i32, %c16_i32_0 : i32
    %c1_i32 = arith.constant 1 : i32
    scf.for %arg11 = %c0_i32 to %1 step %c1_i32  : i32 {
      %21 = arith.addi %0, %arg11 : i32
      %22 = arith.index_cast %21 : i32 to index
      %23 = memref.load %arg1[%22] : memref<64xi32, #tpu.memory_space<smem>>
      %24 = arith.addi %0, %arg11 : i32
      %25 = arith.index_cast %24 : i32 to index
      %26 = memref.load %arg2[%25] : memref<64xi32, #tpu.memory_space<smem>>
      %27 = arith.index_cast %23 : i32 to index
      %c0_17 = arith.constant 0 : index
      %28 = vector.load %arg4[%27, %c0_17] : memref<32x128xf32, #tpu.memory_space<vmem>>, vector<1x128xf32>
      %29 = arith.index_cast %26 : i32 to index
      %c0_18 = arith.constant 0 : index
      %30 = vector.load %arg4[%29, %c0_18] : memref<32x128xf32, #tpu.memory_space<vmem>>, vector<1x128xf32>
      %31 = arith.addf %28, %30 : vector<1x128xf32>
      %32 = arith.index_cast %arg11 : i32 to index
      %c0_19 = arith.constant 0 : index
      %33 = vector.load %arg10[%32, %c0_19] : memref<16x128xf32, #tpu.memory_space<vmem>>, vector<1x128xf32>
      tpu.vector_store %arg10[%32, %c0_19], %31 {strides = array<i32>} : memref<16x128xf32, #tpu.memory_space<vmem>>, vector<1x128xf32>,
    }
    %c16_i32_1 = arith.constant 16 : i32
    %c0 = arith.constant 0 : index
    %c0_2 = arith.constant 0 : index
    %2 = vector.load %arg3[%c0, %c0_2] : memref<16x128xbf16, #tpu.memory_space<vmem>>, vector<16x128xbf16>
    %c0_3 = arith.constant 0 : index
    %c0_4 = arith.constant 0 : index
    %3 = vector.load %arg10[%c0_3, %c0_4] : memref<16x128xf32, #tpu.memory_space<vmem>>, vector<16x128xf32>
    %4 = arith.truncf %3 : vector<16x128xf32> to vector<16x128xbf16>
    %5 = tpu.concatenate %2, %4 in 1 : vector<16x128xbf16>, vector<16x128xbf16> -> vector<16x256xbf16>
    %c0_5 = arith.constant 0 : index
    %c0_6 = arith.constant 0 : index
    %6 = vector.load %arg5[%c0_5, %c0_6] : memref<256x128xbf16, #tpu.memory_space<vmem>>, vector<256x128xbf16>
    %cst = arith.constant dense<0.000000e+00> : vector<16x128xf32>
    %7 = tpu.matmul %5, %6, %cst {dimension_numbers = #tpu.dot_dimension_numbers<[1], [0], [0], [1], [0, 0, 1, 1], [], []>} : vector<16x256xbf16>, vector<256x128xbf16>, vector<16x128xf32> -> vector<16x128xf32>
    %c0_7 = arith.constant 0 : index
    %c0_8 = arith.constant 0 : index
    %8 = vector.load %arg6[%c0_7, %c0_8] : memref<1x128xf32, #tpu.memory_space<vmem>>, vector<1x128xf32>
    %9 = vector.broadcast %8 : vector<1x128xf32> to vector<16x128xf32>
    %10 = arith.addf %7, %9 : vector<16x128xf32>
    %cst_9 = arith.constant 0.000000e+00 : f32
    %11 = vector.broadcast %cst_9 : f32 to vector<16x128xf32>
    %12 = arith.maximumf %10, %11 : vector<16x128xf32>
    %13 = arith.truncf %12 : vector<16x128xf32> to vector<16x128xbf16>
    %c0_10 = arith.constant 0 : index
    %c0_11 = arith.constant 0 : index
    %14 = vector.load %arg7[%c0_10, %c0_11] : memref<128x128xbf16, #tpu.memory_space<vmem>>, vector<128x128xbf16>
    %cst_12 = arith.constant dense<0.000000e+00> : vector<16x128xf32>
    %15 = tpu.matmul %13, %14, %cst_12 {dimension_numbers = #tpu.dot_dimension_numbers<[1], [0], [0], [1], [0, 0, 1, 1], [], []>} : vector<16x128xbf16>, vector<128x128xbf16>, vector<16x128xf32> -> vector<16x128xf32>
    %c0_13 = arith.constant 0 : index
    %c0_14 = arith.constant 0 : index
    %16 = vector.load %arg8[%c0_13, %c0_14] : memref<1x128xf32, #tpu.memory_space<vmem>>, vector<1x128xf32>
    %17 = vector.broadcast %16 : vector<1x128xf32> to vector<16x128xf32>
    %18 = arith.addf %15, %17 : vector<16x128xf32>
    %19 = arith.truncf %18 : vector<16x128xf32> to vector<16x128xbf16>
    %c0_15 = arith.constant 0 : index
    %c0_16 = arith.constant 0 : index
    %20 = vector.load %arg9[%c0_15, %c0_16] : memref<16x128xbf16, #tpu.memory_space<vmem>>, vector<16x128xbf16>
    tpu.vector_store %arg9[%c0_15, %c0_16], %19 {strides = array<i32>} : memref<16x128xbf16, #tpu.memory_space<vmem>>, vector<16x128xbf16>,
    return
  }
  func.func @transform_0(%arg0: i32, %arg1: memref<64xi32, #tpu.memory_space<smem>>, %arg2: memref<64xi32, #tpu.memory_space<smem>>) -> (i32, i32) {
    %c0_i32 = arith.constant 0 : i32
    %c0_i32_0 = arith.constant 0 : i32
    return %arg0, %c0_i32 : i32, i32
  }
  func.func @transform_1(%arg0: i32, %arg1: memref<64xi32, #tpu.memory_space<smem>>, %arg2: memref<64xi32, #tpu.memory_space<smem>>) -> (i32, i32) {
    %c0_i32 = arith.constant 0 : i32
    %c0_i32_0 = arith.constant 0 : i32
    %c0_i32_1 = arith.constant 0 : i32
    return %c0_i32, %c0_i32_0 : i32, i32
  }
  func.func @transform_2(%arg0: i32, %arg1: memref<64xi32, #tpu.memory_space<smem>>, %arg2: memref<64xi32, #tpu.memory_space<smem>>) -> (i32, i32) {
    %c0_i32 = arith.constant 0 : i32
    %c0_i32_0 = arith.constant 0 : i32
    %c0_i32_1 = arith.constant 0 : i32
    return %c0_i32, %c0_i32_0 : i32, i32
  }
  func.func @transform_3(%arg0: i32, %arg1: memref<64xi32, #tpu.memory_space<smem>>, %arg2: memref<64xi32, #tpu.memory_space<smem>>) -> (i32, i32) {
    %c0_i32 = arith.constant 0 : i32
    %c0_i32_0 = arith.constant 0 : i32
    %c0_i32_1 = arith.constant 0 : i32
    return %c0_i32, %c0_i32_0 : i32, i32
  }
  func.func @transform_4(%arg0: i32, %arg1: memref<64xi32, #tpu.memory_space<smem>>, %arg2: memref<64xi32, #tpu.memory_space<smem>>) -> (i32, i32) {
    %c0_i32 = arith.constant 0 : i32
    %c0_i32_0 = arith.constant 0 : i32
    %c0_i32_1 = arith.constant 0 : i32
    return %c0_i32, %c0_i32_0 : i32, i32
  }
  func.func @transform_5(%arg0: i32, %arg1: memref<64xi32, #tpu.memory_space<smem>>, %arg2: memref<64xi32, #tpu.memory_space<smem>>) -> (i32, i32) {
    %c0_i32 = arith.constant 0 : i32
    %c0_i32_0 = arith.constant 0 : i32
    %c0_i32_1 = arith.constant 0 : i32
    return %c0_i32, %c0_i32_0 : i32, i32
  }
  func.func @transform_6(%arg0: i32, %arg1: memref<64xi32, #tpu.memory_space<smem>>, %arg2: memref<64xi32, #tpu.memory_space<smem>>) -> (i32, i32) {
    %c0_i32 = arith.constant 0 : i32
    %c0_i32_0 = arith.constant 0 : i32
    return %arg0, %c0_i32 : i32, i32
  }
}

</mosaic_0001>

<bundles_post_ra>
// kernel: edge_node_forward.4
= control target key start
LH: loop header
LB: loop body
LE: loop exit
PB: predicated region body
PF: predicated region fallthrough
CT: control target
= control target key end

     0   :  { %s201_s0 = inlined_call_operand.vmem [shape: s32[64], index: 0, kind: input, shape index: {}]   ;;  %s202_s2 = inlined_call_operand.vmem [shape: bf16[64,128], index: 2, kind: input, shape index: {}]   ;;  %s203_s3 = inlined_call_operand.vmem [shape: f32[32,128], index: 3, kind: output, shape index: {}]   ;;  %s204_s1 = inlined_call_operand.vmem [shape: s32[64], index: 1, kind: input, shape index: {}]  }
   0x1   :  { %s8_s14 = sshll.u32 %s201_s0, 4  ;;  %s12_s17 = sshll.u32 %s204_s1, 4  ;;  %s9_s14 = int_to_ptr.vmem [resolvable:$true] %s8_s14  ;;  %s13_s17 = int_to_ptr.vmem [resolvable:$true] %s12_s17 }
   0x2   :  { %s108_s18 = scalar_lea.vmem %s9_s14, 16  ;;  %p113_p1 = scmp.lt.s32.totalorder %s9_s14, %s9_s14 }
   0x3   :  { %p109_p0 = scmp.ne.s32.totalorder %s9_s14, %s108_s18  ;;  %p114_p2 = scmp.lt.s32.totalorder %s108_s18, %s108_s18 }
   0x5   :  { %p115_p3 = por %p114_p2, %p113_p1 }
   0x7   :  { %p116_p4 = pnand %p115_p3, %p109_p0 }
   0x9   :  { %119 = shalt.err (!%p116_p4)  }
   0xa   :  { %s142_s19 = smov [#allocation4]   ;;  %s120_s20 = scalar_lea.vmem %s13_s17, 16 }
   0xb   :  { %11 = dma.vmem_to_smem %s9_s14, 16, %s142_s19, [#allocation3] }
   0xc   :  { %p121_p5 = scmp.ne.s32.totalorder %s13_s17, %s120_s20  ;;  %p125_p6 = scmp.lt.s32.totalorder %s13_s17, %s13_s17 }
   0xd   :  { %p126_p7 = scmp.lt.s32.totalorder %s120_s20, %s120_s20 }
   0xf   :  { %p127_p8 = por %p126_p7, %p125_p6 }
  0x11   :  { %p128_p9 = pnand %p127_p8, %p121_p5 }
  0x13   :  { %131 = shalt.err (!%p128_p9)  }
  0x14   :  { %s143_s0 = smov [#allocation5]  }
  0x15   :  { %15 = dma.vmem_to_smem %s13_s17, 16, %s143_s0, [#allocation3] }
  0x16   :  { %136 = dma.done.wait [#allocation3], 32 }
  0x17   :  { %137 = vsyncadd [#allocation3], 4294967264 }
  0x18   :  { %17 = sfence }
  0x19   :  { %v79_v0 = vld [vmem:[%s202_s2] sm:$0xff]   ;;  %v94_v1 = vld [vmem:[%s202_s2 + $0x8] sm:$0xff]   ;;  %v95_v2 = vld [vmem:[%s202_s2 + $0x10] sm:$0xff]   ;;  %v144_v8 = vmov 0.0  }
  0x1a   :  { %v80_v3 = vunpack.c.l.bf16 %v79_v0  ;;  %v81_v4 = vunpack.c.h.bf16 %v79_v0  ;;  %v84_v5 = vunpack.c.l.bf16 %v94_v1  ;;  %v85_v6 = vunpack.c.h.bf16 %v94_v1  ;;  %v96_v7 = vld [vmem:[%s202_s2 + $0x18] sm:$0xff]   ;;  %44 = vst [vmem:[%s203_s3] sm:$0xff] %v144_v8  ;;  %45 = vst [vmem:[%s203_s3 + $0x8] sm:$0xff] %v144_v8  ;;  %s138_s2 = smov 0  }
  0x1b   :  { %46 = vst [vmem:[%s203_s3 + $0x10] sm:$0xff] %v144_v8  ;;  %47 = vst [vmem:[%s203_s3 + $0x18] sm:$0xff] %v144_v8  ;;  %v88_v9 = vunpack.c.l.bf16 %v95_v2  ;;  %v89_v10 = vunpack.c.h.bf16 %v95_v2  ;;  %v92_v11 = vunpack.c.l.bf16 %v96_v7  ;;  %v93_v12 = vunpack.c.h.bf16 %v96_v7 }
  0x1c   :  { %36 = vst [vmem:[#allocation2] sm:$0xff] %v80_v3  ;;  %37 = vst [vmem:[#allocation2 + $0x8] sm:$0xff] %v81_v4 }
  0x1d   :  { %38 = vst [vmem:[#allocation2 + $0x10] sm:$0xff] %v84_v5  ;;  %39 = vst [vmem:[#allocation2 + $0x18] sm:$0xff] %v85_v6 }
  0x1e   :  { %40 = vst [vmem:[#allocation2 + $0x20] sm:$0xff] %v88_v9  ;;  %41 = vst [vmem:[#allocation2 + $0x28] sm:$0xff] %v89_v10 }
  0x1f   :  { %42 = vst [vmem:[#allocation2 + $0x30] sm:$0xff] %v92_v11  ;;  %43 = vst [vmem:[#allocation2 + $0x38] sm:$0xff] %v93_v12 }
  0x20 LB: > { %s56_s9 = sld [smem:[#allocation4 + %s140_s2]]  ;;  %s54_s10 = scalar_lea.vmem [#allocation2], %s140_s2  ;;  %s140_s2 = sphi %s138_s2, %s53_s2  }
  0x21   : > { %s57_s14 = sld [smem:[#allocation5 + %s140_s2]]  ;;  %s53_s2 = sadd.s32 1, %s140_s2  }
  0x22   : > { %p50_p10 = scmp.ge.s32.totalorder %s53_s2, 64  }
  0x26   : > { %v55_v13 = vld [vmem:[%s54_s10] sm:$0x1]  ;;  %s58_s13 = scalar_lea.vmem %s203_s3, %s56_s9 }
  0x27   : > { %v59_v14 = vld [vmem:[%s58_s13] sm:$0x1]  ;;  %s62_s17 = scalar_lea.vmem %s203_s3, %s57_s14 }
  0x28   : > { %v60_v15 = vadd.f32 %v59_v14, %v55_v13 }
  0x2a   : > { %61 = vst [vmem:[%s58_s13] sm:$0x1] %v60_v15 }
  0x2e   :  { %52 = sbr.rel (!%p50_p10) target bundleno = 32 (0x20), region = 34 }
  0x31   : > { %v63_v16 = vld [vmem:[%s62_s17] sm:$0x1] }
  0x32   : > { %v64_v17 = vadd.f32 %v63_v16, %v55_v13 }
  0x34   : > { %65 = vst [vmem:[%s62_s17] sm:$0x1] %v64_v17 }

// kernel: edge_node_forward.5
= control target key start
LH: loop header
LB: loop body
LE: loop exit
PB: predicated region body
PF: predicated region fallthrough
CT: control target
= control target key end

     0   :  { %11 = vsyncpa [#allocation3], 0  ;;  %s1138_s0 = inlined_call_operand.vmem [shape: f32[32,128], index: 0, kind: input, shape index: {}]   ;;  %s1139_s1 = inlined_call_operand.vmem [shape: f32[32,128], index: 1, kind: input, shape index: {}]   ;;  %s1140_s2 = inlined_call_operand.vmem [shape: bf16[256,128], index: 2, kind: input, shape index: {}]   ;;  %s1141_s3 = inlined_call_operand.vmem [shape: f32[1,128], index: 3, kind: input, shape index: {}]   ;;  %s1142_s4 = inlined_call_operand.vmem [shape: bf16[128,128], index: 4, kind: input, shape index: {}]   ;;  %s1143_s5 = inlined_call_operand.vmem [shape: f32[1,128], index: 5, kind: input, shape index: {}]   ;;  %s1144_s6 = inlined_call_operand.hbm [shape: bf16[32,128], index: 6, kind: output, shape index: {}]  }
   0x1   :  { %13 = vsyncpa [#allocation3 + $0x1], 0  ;;  %s943_s21 = smov 0   ;;  %s945_s22 = smov 0  }
   0x2   :  { %s947_s23 = smov 0   ;;  %s949_s24 = smov 0  }
   0x3 LB: > { %s964_s25 = sadd.s32 4294967295, %s901_s24   ;;  %s671_s26 = sadd.s32 4294967294, %s901_s24   ;;  %s901_s24 = sphi %s949_s24, %s1150_s24   ;;  %s897_s23 = sphi %s947_s23, %s1149_s23   ;;  %s893_s22 = sphi %s945_s22, %s1148_s22   ;;  %s889_s21 = sphi %s943_s21, %s1147_s21  }
   0x4   : > { %s968_s27 = sadd.s32 1, %s901_s24   ;;  %s162_s28 = sadd.s32 1, %s897_s23 }
   0x5   : > { %s159_s29 = ssub.s32 %s901_s24, %s968_s27  ;;  %p172_p0 = scmp.ne.s32.totalorder %s897_s23, %s893_s22 }
   0x6   : > { %p160_p1 = scmp.eq.s32.totalorder %s159_s29, 0  ;;  %p173_p2 = scmp.eq.s32.totalorder %s964_s25, 1 }
   0x7   : > { %p178_p3 = scmp.ne.s32.totalorder %s893_s22, %s889_s21  ;;  %p179_p4 = scmp.eq.s32.totalorder %s671_s26, 1 }
   0x8   : > { %s979_s30 = scalar_select %p160_p1, %s897_s23, %s162_s28  }
   0x9   : > { %p981_p5 = por %p173_p2, %p172_p0  ;;  %p985_p6 = por %p179_p4, %p178_p3 }
   0xa   : > { %p674_p7 = scmp.ge.s32.totalorder %s901_s24, 1  ;;  %p227_p8 = scmp.lt.s32.totalorder %s901_s24, 3 }
   0xc   : > { %p228_p9 = pnand %p674_p7, %p227_p8 }
   0xd   : > { %v815_v0 = vld [vmem:[%s1140_s2 + $0x40] sm:$0xff] (!%p228_p9)   ;;  %s676_s11 = sshll.u32 (!%p228_p9), %s964_s25, 1  ;;  %v817_v2 = vld [vmem:[%s1140_s2 + $0x48] sm:$0xff] (!%p228_p9)   ;;  %v903_v4 = vmov (!%p228_p9), 0.0   ;;  %v819_v5 = vld [vmem:[%s1140_s2 + $0x50] sm:$0xff] (!%p228_p9)   ;;  %vm904_vm0 = vmmov (!%p228_p9), 0  }
   0xe   : > { %231 = sbr.rel (%p228_p9) target bundleno = 502 (0x1f6), region = 44  ;;  %v816_v1 = vld [vmem:[%s1140_s2] sm:$0xff] (!%p228_p9)   ;;  %p263_p10 = scmp.lt.s32.totalorder (!%p228_p9), %s676_s11, 3  ;;  %721 = vmatprep.subr.bf16.mxu0 (!%p228_p9), %v815_v0  ;;  %v818_v3 = vld [vmem:[%s1140_s2 + $0x8] sm:$0xff] (!%p228_p9)   ;;  %752 = vmatprep.subr.bf16.mxu1 (!%p228_p9), %v903_v4  ;;  %v820_v6 = vld [vmem:[%s1140_s2 + $0x10] sm:$0xff] (!%p228_p9)  }
   0xf   : > { %722 = vmatpush3.bf16.msra.mxu0 (!%p228_p9), %v816_v1  ;;  %v821_v7 = vld [vmem:[%s1140_s2 + $0x58] sm:$0xff] (!%p228_p9)   ;;  %v823_v9 = vld [vmem:[%s1140_s2 + $0x60] sm:$0xff] (!%p228_p9)   ;;  %v825_v11 = vld [vmem:[%s1140_s2 + $0x68] sm:$0xff] (!%p228_p9)   ;;  %768 = vmatprep.mubr.msk.bf16.mxu1 (!%p228_p9), %vm904_vm0, %v903_v4  ;;  %s259_s29 = sand.u32 (!%p228_p9), 1, %s893_s22   ;;  %s715_s15 = sshll.u32 (!%p228_p9), %s964_s25, 7 }
  0x10   : > { %723 = vmatprep.subr.bf16.mxu0 (!%p228_p9), %v817_v2  ;;  %v822_v8 = vld [vmem:[%s1140_s2 + $0x18] sm:$0xff] (!%p228_p9)   ;;  %v824_v10 = vld [vmem:[%s1140_s2 + $0x20] sm:$0xff] (!%p228_p9)   ;;  %v826_v14 = vld [vmem:[%s1140_s2 + $0x28] sm:$0xff] (!%p228_p9)   ;;  %s675_s10 = sshll.u32 (!%p228_p9), %s259_s29, 3  ;;  %s1095_s18 = scalar_lea.hbm (!%p228_p9), %s1144_s6, %s715_s15 }
  0x11   : > { %v831_v16 = vld [vmem:[%s1142_s4] sm:$0xff] (!%p228_p9)   ;;  %v827_v17 = vld [vmem:[%s1140_s2 + $0x70] sm:$0xff] (!%p228_p9)   ;;  %v832_v18 = vld [vmem:[%s1142_s4 + $0x8] sm:$0xff] (!%p228_p9)   ;;  %s261_s14 = scalar_lea.vmem (!%p228_p9), [#allocation2], %s675_s10  ;;  %s1097_s19 = scalar_lea.sflag (!%p228_p9), [#allocation3], %s259_s29 }
  0x12   : > { %753 = vmatpush3.bf16.msra.mxu1 (!%p228_p9), %v831_v16  ;;  %v828_v19 = vld [vmem:[%s1140_s2 + $0x30] sm:$0xff] (!%p228_p9)   ;;  %v829_v20 = vld [vmem:[%s1140_s2 + $0x78] sm:$0xff] (!%p228_p9)   ;;  %v835_v27 = vld [vmem:[%s1142_s4 + $0x20] sm:$0xff] (!%p228_p9)   ;;  %s905_s25 = smov (!%p228_p9), [#allocation2]  }
  0x13   : > { %724 = vmatpush3.bf16.msra.mxu0 (!%p228_p9), %v818_v3  ;;  %754 = vmatprep.subr.bf16.mxu1 (!%p228_p9), %v903_v4  ;;  %v833_v21 = vld [vmem:[%s1142_s4 + $0x10] sm:$0xff] (!%p228_p9)   ;;  %v830_v22 = vld [vmem:[%s1140_s2 + $0x38] sm:$0xff] (!%p228_p9)   ;;  %v836_v28 = vld [vmem:[%s1142_s4 + $0x28] sm:$0xff] (!%p228_p9)   ;;  %s843_s20 = sshll.u32 (!%p228_p9), %s905_s25, 4  ;;  %s844_s20 = int_to_ptr.vmem [resolvable:$false] %s843_s20 }
  0x14   : > { %725 = vmatprep.subr.bf16.mxu0 (!%p228_p9), %v819_v5  ;;  %v834_v25 = vld [vmem:[%s1142_s4 + $0x18] sm:$0xff] (!%p228_p9)   ;;  %v837_v29 = vld [vmem:[%s1142_s4 + $0x30] sm:$0xff] (!%p228_p9)   ;;  %v680_v32 = vld [vmem:[%s1141_s3] ss:$0 sm:$0xff] (!%p228_p9) }
  0x15   : > { %s1152_s11 = smov (!%p263_p10, %s676_s11), 3  ;;  %v838_v30 = vld [vmem:[%s1142_s4 + $0x38] sm:$0xff]   ;;  %v697_v43 = vld [vmem:[%s1143_s5] ss:$0 sm:$0xff] }
  0x16   : > { %s677_s9 = sshll.u32 %s1152_s11, 3  ;;  %755 = vmatpush3.bf16.msra.mxu1 %v832_v18 }
  0x17   : > { %726 = vmatpush3.bf16.msra.mxu0 %v820_v6  ;;  %s272_s17 = scalar_lea.vmem %s1139_s1, %s677_s9  ;;  %s266_s26 = scalar_lea.vmem %s1138_s0, %s677_s9  ;;  %756 = vmatprep.subr.bf16.mxu1 %v903_v4 }
  0x18   : > { %727 = vmatprep.subr.bf16.mxu0 %v821_v7  ;;  %v279_v12 = vld [vmem:[%s272_s17] sm:$0xff]  ;;  %v280_v13 = vld [vmem:[%s272_s17 + $0x8] sm:$0xff]  ;;  %s597_s9 = sshll.u32 %s261_s14, 4  ;;  %s1090_s9 = int_to_ptr.vmem [resolvable:$true] %s597_s9 }
  0x19   : > { %v281_v15 = vpack.c.bf16 %v280_v13, %v279_v12  ;;  %v276_v23 = vld [vmem:[%s266_s26] sm:$0xff]  ;;  %v277_v24 = vld [vmem:[%s266_s26 + $0x8] sm:$0xff]  ;;  %s839_s11 = scalar_lea.vmem %s1090_s9, 128  ;;  %s845_s26 = scalar_lea.vmem %s844_s20, 256 }
  0x1a   : > { %757 = vmatpush3.bf16.msra.mxu1 %v833_v21  ;;  %v278_v26 = vpack.c.bf16 %v277_v24, %v276_v23  ;;  %p840_p11 = scmp.ne.s32.totalorder %s1090_s9, %s839_s11  ;;  %p846_p0 = scmp.lt.s32.totalorder %s1090_s9, %s844_s20 }
  0x1b   : > { %728 = vmatpush3.bf16.msra.mxu0 %v822_v8  ;;  %449 = vmatprep.mubr.bf16.mxu0 %v281_v15  ;;  %p847_p1 = scmp.lt.s32.totalorder %s845_s26, %s839_s11 }
  0x1c   : > { %729 = vmatprep.subr.bf16.mxu0 %v823_v9  ;;  %758 = vmatprep.subr.bf16.mxu1 %v903_v4  ;;  %p841_p12 = pnand %p840_p11, %p981_p5 }
  0x1d   : > { %p848_p2 = por %p847_p1, %p846_p0 }
  0x1e   : > { %759 = vmatpush3.bf16.msra.mxu1 %v834_v25  ;;  %p842_p13 = pneg %p841_p12 }
  0x1f   : > { %730 = vmatpush3.bf16.msra.mxu0 %v824_v10  ;;  %760 = vmatprep.subr.bf16.mxu1 %v903_v4 }
  0x20   : > { %731 = vmatprep.subr.bf16.mxu0 %v825_v11  ;;  %p849_p3 = pnand %p848_p2, %p842_p13 }
  0x22   : > { %761 = vmatpush3.bf16.msra.mxu1 %v835_v27 }
  0x23   : > { %732 = vmatpush3.bf16.msra.mxu0 %v826_v14  ;;  %762 = vmatprep.subr.bf16.mxu1 %v903_v4 }
  0x24   : > { %733 = vmatprep.subr.bf16.mxu0 %v827_v17 }
  0x26   : > { %763 = vmatpush3.bf16.msra.mxu1 %v836_v28 }
  0x27   : > { %734 = vmatpush3.bf16.msra.mxu0 %v828_v19  ;;  %764 = vmatprep.subr.bf16.mxu1 %v903_v4 }
  0x28   : > { %735 = vmatprep.subr.bf16.mxu0 %v829_v20 }
  0x2a   : > { %765 = vmatpush3.bf16.msra.mxu1 %v837_v29 }
  0x2b   : > { %736 = vmatpush3.bf16.msra.mxu0 %v830_v22  ;;  %766 = vmatprep.subr.bf16.mxu1 %v903_v4 }
  0x2e   : > { %450 = vmatmul.mubr.bf16.vlgmr.msra.gmra.mrb[0].mxu0 %v278_v26  ;;  %767 = vmatpush3.bf16.msra.mxu1 %v838_v30 }
 0x101   : > { %v737_v31 = vpop.f32.mrb[0].mxu0 }
 0x102   : > { %v738_v33 = vpop.f32.mrb[1].mxu0 }
 0x103   : > { %v739_v34 = vadd.f32 %v738_v33, %v737_v31  ;;  %v740_v35 = vpop.f32.mrb[2].mxu0 }
 0x104   : > { %v741_v36 = vpop.f32.mrb[3].mxu0 }
 0x105   : > { %v452_v37 = vadd.f32 %v739_v34, %v680_v32  ;;  %v742_v38 = vadd.f32 %v741_v36, %v740_v35 }
 0x107   : > { %v455_v39 = vadd.f32 %v742_v38, %v680_v32  ;;  %v458_v40 = vmax.f32 %v452_v37, 0.0 }
 0x109   : > { %v459_v41 = vmax.f32 %v455_v39, 0.0 }
 0x10b   : > { %v460_v42 = vpack.c.bf16 %v459_v41, %v458_v40 }
 0x10d   : > { %769 = vmatmul.mubr.bf16.vlgmr.msra.gmra.mrb[0].mxu1 %v460_v42 }
 0x1e0   : > { %v566_v44 = vpop.f32.mrb[0].mxu1 }
 0x1e1   : > { %v770_v45 = vpop.f32.mrb[1].mxu1  ;;  %v567_v47 = vadd.f32 %v697_v43, %v566_v44 }
 0x1e2   : > { %v569_v46 = vpop.f32.mrb[2].mxu1 }
 0x1e3   : > { %v570_v48 = vadd.f32 %v697_v43, %v569_v46  ;;  %v771_v49 = vpop.f32.mrb[3].mxu1 }
 0x1e5   : > { %v719_v50 = vpack.c.bf16 %v570_v48, %v567_v47 }
 0x1e7   : > { %720 = vst [vmem:[%s261_s14] sm:$0xff] %v719_v50  }
 0x1e8   : > { %852 = shalt.err (!%p849_p3)
}
 0x1e9   : > { %s853_s28 = scalar_lea.hbm %s1095_s18, 128  ;;  %s857_s12 = scalar_lea.hbm %s1144_s6, 256 }
 0x1ea   : > { %p854_p4 = scmp.ne.s32.totalorder %s1095_s18, %s853_s28  ;;  %p858_p9 = scmp.lt.u32.totalorder %s1095_s18, %s1144_s6 }
 0x1eb   : > { %p859_p10 = scmp.lt.u32.totalorder %s857_s12, %s853_s28  ;;  %p861_p12 = scmp.lt.u32.totalorder %s853_s28, %s1095_s18 }
 0x1ec   : > { %p855_p7 = pnand %p854_p4, %p981_p5 }
 0x1ed   : > { %p860_p11 = por %p859_p10, %p858_p9 }
 0x1ee   : > { %p856_p8 = pneg %p855_p7 }
 0x1ef   : > { %p862_p13 = por %p861_p12, %p860_p11 }
 0x1f1   : > { %p863_p0 = pnand %p862_p13, %p856_p8 }
 0x1f3   : > { %866 = shalt.err (!%p863_p0)
}
 0x1f4   : > { %s906_s15 = smov 64   ;;  %s907_s16 = smov 4  }
 0x1f5   : > { %772 = dma.vmem_to_hbm [thread:$0]  (%p981_p5), %s1090_s9, 128, %s1095_s18, %s1097_s19, %s906_s15, %s906_s15, %s907_s16  }
 0x1f6 PF: > { %p778_p1 = scmp.ge.s32.totalorder %s901_s24, 2  ;;  %s612_s17 = sand.u32 1, %s889_s21  }
 0x1f7   : > { %s613_s11 = scalar_lea.sflag [#allocation3], %s612_s17 }
 0x1f8   : > { %p775_p2 = pnand %p778_p1, %p985_p6 }
 0x1fa   : > { %884 = dma.done.wait (!%p775_p2), %s613_s11, 128  }
 0x1fb   : > { %886 = vsyncadd (!%p775_p2), %s613_s11, 4294967168  ;;  %p16_p3 = scmp.ge.s32.totalorder %s968_s27, 4   ;;  %s1147_s21 = smov %s893_s22 }
 0x1fc   : > { %s1148_s22 = smov %s897_s23  ;;  %s1149_s23 = smov %s979_s30 }
 0x1fd   : > { %s1150_s24 = smov %s968_s27  ;;  %18 = sbr.rel (!%p16_p3) target bundleno = 3 (0x3), region = 82 }
 0x204   :  { %618 = vsyncpa [#allocation3], 1 }
 0x205   :  { %620 = vsyncpa [#allocation3 + $0x1], 1 }

// kernel: edge_node_forward.3
= control target key start
LH: loop header
LB: loop body
LE: loop exit
PB: predicated region body
PF: predicated region fallthrough
CT: control target
= control target key end

     0   :  { %s1009_s0 = inlined_call_operand.vmem [shape: s32[64], index: 0, kind: input, shape index: {}]   ;;  %s1010_s2 = inlined_call_operand.vmem [shape: bf16[64,128], index: 2, kind: input, shape index: {}]   ;;  %s1011_s3 = inlined_call_operand.vmem [shape: f32[32,128], index: 3, kind: input, shape index: {}]   ;;  %s1012_s4 = inlined_call_operand.vmem [shape: bf16[256,128], index: 4, kind: input, shape index: {}]   ;;  %s1013_s5 = inlined_call_operand.vmem [shape: f32[1,128], index: 5, kind: input, shape index: {}]   ;;  %s1014_s6 = inlined_call_operand.vmem [shape: bf16[128,128], index: 6, kind: input, shape index: {}]   ;;  %s1015_s7 = inlined_call_operand.vmem [shape: f32[1,128], index: 7, kind: input, shape index: {}]   ;;  %s1016_s8 = inlined_call_operand.vmem [shape: bf16[64,128], index: 8, kind: output, shape index: {}]   ;;  %s1017_s1 = inlined_call_operand.vmem [shape: s32[64], index: 1, kind: input, shape index: {}]  }
   0x1   :  { %s13_s29 = sshll.u32 %s1009_s0, 4  ;;  %s17_s10 = sshll.u32 %s1017_s1, 4  ;;  %s14_s29 = int_to_ptr.vmem [resolvable:$true] %s13_s29  ;;  %s18_s10 = int_to_ptr.vmem [resolvable:$true] %s17_s10 }
   0x2   :  { %s805_s11 = scalar_lea.vmem %s14_s29, 16  ;;  %p810_p1 = scmp.lt.s32.totalorder %s14_s29, %s14_s29 }
   0x3   :  { %p806_p0 = scmp.ne.s32.totalorder %s14_s29, %s805_s11  ;;  %p811_p2 = scmp.lt.s32.totalorder %s805_s11, %s805_s11 }
   0x5   :  { %p812_p3 = por %p811_p2, %p810_p1 }
   0x7   :  { %p813_p4 = pnand %p812_p3, %p806_p0 }
   0x9   :  { %816 = shalt.err (!%p813_p4)  }
   0xa   :  { %s847_s12 = smov [#allocation4]   ;;  %s817_s13 = scalar_lea.vmem %s18_s10, 16 }
   0xb   :  { %16 = dma.vmem_to_smem %s14_s29, 16, %s847_s12, [#allocation3] }
   0xc   :  { %p818_p5 = scmp.ne.s32.totalorder %s18_s10, %s817_s13  ;;  %p822_p6 = scmp.lt.s32.totalorder %s18_s10, %s18_s10 }
   0xd   :  { %p823_p7 = scmp.lt.s32.totalorder %s817_s13, %s817_s13 }
   0xf   :  { %p824_p8 = por %p823_p7, %p822_p6 }
  0x11   :  { %p825_p9 = pnand %p824_p8, %p818_p5 }
  0x13   :  { %828 = shalt.err (!%p825_p9)  }
  0x14   :  { %s848_s0 = smov [#allocation5]  }
  0x15   :  { %20 = dma.vmem_to_smem %s18_s10, 16, %s848_s0, [#allocation3] }
  0x16   :  { %837 = dma.done.wait [#allocation3], 32 }
  0x17   :  { %838 = vsyncadd [#allocation3], 4294967264 }
  0x18   :  { %22 = sfence }
  0x19   :  { %s902_s1 = smov 0  }
  0x1a LB: > { %s661_s14 = sadd.s32 4294967295, %s841_s1   ;;  %p665_p10 = scmp.ge.s32.totalorder %s841_s1, 1  ;;  %s841_s1 = sphi %s902_s1, %s28_s1  }
  0x1b   : > { %p225_p11 = scmp.lt.s32.totalorder %s841_s1, 5 }
  0x1d   : > { %p226_p12 = pnand %p665_p10, %p225_p11 }
  0x1e   : > { %s666_s15 = sshll.u32 (!%p226_p12), %s661_s14, 1  ;;  %s670_s16 = sshll.u32 (!%p226_p12), %s661_s14, 4 }
  0x1f   : > { %229 = sbr.rel (%p226_p12) target bundleno = 519 (0x207), region = 44  ;;  %p256_p13 = scmp.lt.s32.totalorder (!%p226_p12), %s666_s15, 7 }
  0x20   : > { %s843_s24 = smov (!%p226_p12), 0  }
  0x26   : > { %s1019_s15 = smov (!%p256_p13, %s666_s15), 7 }
  0x27   : > { %s667_s17 = sshll.u32 %s1019_s15, 2 }
  0x28   : > { %s913_s20 = scalar_lea.vmem %s1010_s2, %s667_s17  ;;  %s918_s23 = scalar_lea.vmem %s1016_s8, %s667_s17 }
  0x29 LB: >> { %s275_s25 = sadd.s32 %s845_s24, %s670_s16  ;;  %s283_s12 = scalar_lea.vmem [#allocation2], %s845_s24  ;;  %s845_s24 = sphi %s843_s24, %s274_s24  }
  0x2a   : >> { %s276_s26 = sld [smem:[#allocation4 + %s275_s25]]  ;;  %s274_s24 = sadd.s32 1, %s845_s24  }
  0x2b   : >> { %s277_s27 = sld [smem:[#allocation5 + %s275_s25]]  ;;  %p271_p0 = scmp.ge.s32.totalorder %s274_s24, 16  }
  0x2c   : > { %v780_v3 = vld [vmem:[%s1012_s4 + $0x40] sm:$0xff] (%p271_p0)   ;;  %v849_v5 = vmov (%p271_p0), 0.0   ;;  %v782_v6 = vld [vmem:[%s1012_s4 + $0x48] sm:$0xff] (%p271_p0)   ;;  %v784_v8 = vld [vmem:[%s1012_s4 + $0x50] sm:$0xff] (%p271_p0)   ;;  %vm850_vm0 = vmmov (%p271_p0), 0  }
  0x2d   : > { %v781_v4 = vld [vmem:[%s1012_s4] sm:$0xff] (%p271_p0)   ;;  %740 = vmatprep.subr.bf16.mxu1 (%p271_p0), %v849_v5  ;;  %709 = vmatprep.subr.bf16.mxu0 (%p271_p0), %v780_v3  ;;  %v783_v7 = vld [vmem:[%s1012_s4 + $0x8] sm:$0xff] (%p271_p0)   ;;  %v785_v9 = vld [vmem:[%s1012_s4 + $0x10] sm:$0xff] (%p271_p0)  }
  0x2e   : > { %710 = vmatpush3.bf16.msra.mxu0 (%p271_p0), %v781_v4  ;;  %v786_v10 = vld [vmem:[%s1012_s4 + $0x58] sm:$0xff] (%p271_p0)   ;;  %v788_v12 = vld [vmem:[%s1012_s4 + $0x60] sm:$0xff] (%p271_p0)   ;;  %v790_v14 = vld [vmem:[%s1012_s4 + $0x68] sm:$0xff] (%p271_p0)   ;;  %756 = vmatprep.mubr.msk.bf16.mxu1 (%p271_p0), %vm850_vm0, %v849_v5 }
  0x2f   : > { %273 = sbr.rel (!%p271_p0) target bundleno = 41 (0x29), region = 84  ;;  %711 = vmatprep.subr.bf16.mxu0 (%p271_p0), %v782_v6  ;;  %v787_v11 = vld [vmem:[%s1012_s4 + $0x18] sm:$0xff] (%p271_p0)   ;;  %v789_v13 = vld [vmem:[%s1012_s4 + $0x20] sm:$0xff] (%p271_p0)   ;;  %v791_v17 = vld [vmem:[%s1012_s4 + $0x28] sm:$0xff] (%p271_p0)  }
  0x30   : >> { %s278_s30 = scalar_lea.vmem %s1011_s3, %s276_s26  ;;  %v797_v19 = vld [vmem:[%s1014_s6] sm:$0xff] (%p271_p0)   ;;  %v792_v20 = vld [vmem:[%s1012_s4 + $0x70] sm:$0xff] (%p271_p0)   ;;  %v798_v21 = vld [vmem:[%s1014_s6 + $0x8] sm:$0xff] (%p271_p0)  }
  0x31   : >> { %s280_s11 = scalar_lea.vmem %s1011_s3, %s277_s27  ;;  %v279_v0 = vld [vmem:[%s278_s30] sm:$0x1]  ;;  %741 = vmatpush3.bf16.msra.mxu1 (%p271_p0), %v797_v19  ;;  %v793_v22 = vld [vmem:[%s1012_s4 + $0x30] sm:$0xff] (%p271_p0)   ;;  %v794_v23 = vld [vmem:[%s1012_s4 + $0x78] sm:$0xff] (%p271_p0)  }
  0x32   : >> { %v281_v1 = vld [vmem:[%s280_s11] sm:$0x1]  ;;  %712 = vmatpush3.bf16.msra.mxu0 (%p271_p0), %v783_v7  ;;  %742 = vmatprep.subr.bf16.mxu1 (%p271_p0), %v849_v5  ;;  %v799_v24 = vld [vmem:[%s1014_s6 + $0x10] sm:$0xff] (%p271_p0)   ;;  %v795_v25 = vld [vmem:[%s1012_s4 + $0x38] sm:$0xff] (%p271_p0)  }
  0x33   : >> { %v282_v2 = vadd.f32 %v281_v1, %v279_v0  ;;  %713 = vmatprep.subr.bf16.mxu0 (%p271_p0), %v784_v8  ;;  %v800_v26 = vld [vmem:[%s1014_s6 + $0x18] sm:$0xff] (%p271_p0)   ;;  %v796_v27 = vld [vmem:[%s913_s20] sm:$0xff] (%p271_p0)   ;;  %v802_v29 = vld [vmem:[%s1014_s6 + $0x28] sm:$0xff] (%p271_p0)  }
  0x34   : > { %v801_v28 = vld [vmem:[%s1014_s6 + $0x20] sm:$0xff] (%p271_p0)   ;;  %v803_v30 = vld [vmem:[%s1014_s6 + $0x30] sm:$0xff] (%p271_p0)   ;;  %v804_v31 = vld [vmem:[%s1014_s6 + $0x38] sm:$0xff] (%p271_p0)  }
  0x35   : >> { %284 = vst [vmem:[%s283_s12] sm:$0x1] %v282_v2  ;;  %743 = vmatpush3.bf16.msra.mxu1 (%p271_p0), %v798_v21  ;;  %v672_v33 = vld [vmem:[%s1013_s5] ss:$0 sm:$0xff] (%p271_p0) }
  0x36   : > { %714 = vmatpush3.bf16.msra.mxu0 %v785_v9  ;;  %744 = vmatprep.subr.bf16.mxu1 %v849_v5  ;;  %v689_v44 = vld [vmem:[%s1015_s7] ss:$0 sm:$0xff] }
  0x37   : > { %715 = vmatprep.subr.bf16.mxu0 %v786_v10 }
  0x39   : > { %745 = vmatpush3.bf16.msra.mxu1 %v799_v24 }
  0x3a   : > { %716 = vmatpush3.bf16.msra.mxu0 %v787_v11  ;;  %746 = vmatprep.subr.bf16.mxu1 %v849_v5 }
  0x3b   : > { %717 = vmatprep.subr.bf16.mxu0 %v788_v12 }
  0x3c   : > { %v287_v15 = vld [vmem:[#allocation2] sm:$0xff]  ;;  %v288_v16 = vld [vmem:[#allocation2 + $0x8] sm:$0xff] }
  0x3d   : > { %v289_v18 = vpack.c.bf16 %v288_v16, %v287_v15  ;;  %747 = vmatpush3.bf16.msra.mxu1 %v800_v26 }
  0x3e   : > { %718 = vmatpush3.bf16.msra.mxu0 %v789_v13  ;;  %748 = vmatprep.subr.bf16.mxu1 %v849_v5 }
  0x3f   : > { %463 = vmatprep.mubr.bf16.mxu0 %v289_v18  ;;  %719 = vmatprep.subr.bf16.mxu0 %v790_v14 }
  0x41   : > { %749 = vmatpush3.bf16.msra.mxu1 %v801_v28 }
  0x42   : > { %720 = vmatpush3.bf16.msra.mxu0 %v791_v17  ;;  %750 = vmatprep.subr.bf16.mxu1 %v849_v5 }
  0x43   : > { %721 = vmatprep.subr.bf16.mxu0 %v792_v20 }
  0x45   : > { %751 = vmatpush3.bf16.msra.mxu1 %v802_v29 }
  0x46   : > { %722 = vmatpush3.bf16.msra.mxu0 %v793_v22  ;;  %752 = vmatprep.subr.bf16.mxu1 %v849_v5 }
  0x47   : > { %723 = vmatprep.subr.bf16.mxu0 %v794_v23 }
  0x49   : > { %753 = vmatpush3.bf16.msra.mxu1 %v803_v30 }
  0x4a   : > { %724 = vmatpush3.bf16.msra.mxu0 %v795_v25  ;;  %754 = vmatprep.subr.bf16.mxu1 %v849_v5 }
  0x4d   : > { %464 = vmatmul.mubr.bf16.vlgmr.msra.gmra.mrb[0].mxu0 %v796_v27  ;;  %755 = vmatpush3.bf16.msra.mxu1 %v804_v31 }
 0x120   : > { %v725_v32 = vpop.f32.mrb[0].mxu0 }
 0x121   : > { %v726_v34 = vpop.f32.mrb[1].mxu0 }
 0x122   : > { %v727_v35 = vadd.f32 %v726_v34, %v725_v32  ;;  %v728_v36 = vpop.f32.mrb[2].mxu0 }
 0x123   : > { %v729_v37 = vpop.f32.mrb[3].mxu0 }
 0x124   : > { %v466_v38 = vadd.f32 %v727_v35, %v672_v33  ;;  %v730_v39 = vadd.f32 %v729_v37, %v728_v36 }
 0x126   : > { %v469_v40 = vadd.f32 %v730_v39, %v672_v33  ;;  %v472_v41 = vmax.f32 %v466_v38, 0.0 }
 0x128   : > { %v473_v42 = vmax.f32 %v469_v40, 0.0 }
 0x12a   : > { %v474_v43 = vpack.c.bf16 %v473_v42, %v472_v41 }
 0x12c   : > { %757 = vmatmul.mubr.bf16.vlgmr.msra.gmra.mrb[0].mxu1 %v474_v43 }
 0x1ff   : > { %v580_v45 = vpop.f32.mrb[0].mxu1 }
 0x200   : > { %v758_v46 = vpop.f32.mrb[1].mxu1  ;;  %v581_v48 = vadd.f32 %v689_v44, %v580_v45 }
 0x201   : > { %v583_v47 = vpop.f32.mrb[2].mxu1 }
 0x202   : > { %v584_v49 = vadd.f32 %v689_v44, %v583_v47  ;;  %v759_v50 = vpop.f32.mrb[3].mxu1 }
 0x204   : > { %v707_v51 = vpack.c.bf16 %v584_v49, %v581_v48 }
 0x206   : > { %708 = vst [vmem:[%s918_s23] sm:$0xff] %v707_v51  }
 0x207 PF: > { %s28_s1 = sadd.s32 1, %s841_s1  }
 0x208   : > { %p25_p1 = scmp.ge.s32.totalorder %s28_s1, 6  }
 0x20a   :  { %27 = sbr.rel (!%p25_p1) target bundleno = 26 (0x1a), region = 95 }

</bundles_post_ra>
